<compile_context>
chip_gen: v6e
topology: v6e:2x2x1
jax: 0.10.0
libtpu: 0.0.40
codegen_flags: <defaults>
</compile_context>

<pallas_src>
import functools

import jax
import jax.numpy as jnp
from jax.experimental import pallas as pl
from jax.experimental.pallas import tpu as pltpu


def _dino_loss_kernel(student_ref, teacher_ref, center_ref, ones_col_ref, ones_row_ref,
                      loss_part_ref, center_part_ref,
                      *, inv_teacher_temp, inv_student_temp, batch_size,
                      tile_rows, tiles_per_split, masked, approx_reciprocal):
    step = pl.program_id(1)

    @pl.when(step == 0)
    def _init():
        loss_part_ref[...] = jnp.zeros_like(loss_part_ref)
        center_part_ref[...] = jnp.zeros_like(center_part_ref)

    s = student_ref[...].astype(jnp.float32)      # (TB, D)
    t = teacher_ref[...].astype(jnp.float32)      # (TB, D)
    c = center_ref[...].astype(jnp.float32)       # (1, D)
    ones_col = ones_col_ref[...]                  # (D, 1)  f32, resident
    ones_row = ones_row_ref[...]                  # (1, TB) f32, resident

    # --- teacher softmax numerator: max-reduce stays on XLU, exp on EUP ---
    t_logits = (t - c) * inv_teacher_temp
    t_exp = jnp.exp(t_logits - jnp.max(t_logits, axis=-1, keepdims=True))
    # lane sum on the (otherwise idle) MXU; reciprocal on the EUP
    t_sum = jnp.dot(t_exp, ones_col, preferred_element_type=jnp.float32)      # (TB, 1)
    t_recip = pl.reciprocal(t_sum, approx=approx_reciprocal)
    t_out = t_exp * t_recip                                                   # (TB, D)

    # --- student log-sum-exp pieces (denominator sum on the MXU) ---
    s_shift = s * inv_student_temp
    s_shift = s_shift - jnp.max(s_shift, axis=-1, keepdims=True)
    s_sum = jnp.dot(jnp.exp(s_shift), ones_col, preferred_element_type=jnp.float32)  # (TB,1)

    # --- fused per-row cross-entropy:
    #     -sum_d t_out*(s_shift - log s_sum) = log(s_sum) - (sum_d t_exp*s_shift)/t_sum
    dot_row = jnp.dot(t_exp * s_shift, ones_col, preferred_element_type=jnp.float32)  # (TB,1)
    per_row = jnp.log(s_sum) - dot_row * t_recip                              # (TB, 1)

    if masked:
        # Ragged last tile: zero contributions from padded rows.  Select AFTER
        # the math so NaN/Inf from the uninitialized padded region never
        # propagates into the accumulators.
        tile_idx = pl.program_id(0) * tiles_per_split + step
        row = tile_idx * tile_rows + jax.lax.broadcasted_iota(jnp.int32, (tile_rows, 1), 0)
        valid = row < batch_size
        per_row = jnp.where(valid, per_row, 0.0)
        t_out = jnp.where(valid, t_out, 0.0)

    # --- accumulate straight into the resident per-split output blocks ---
    loss_part_ref[...] += jnp.sum(per_row, axis=0, keepdims=True)             # (1, 1)
    # cross-row column sum on the MXU: (1, TB) @ (TB, D) -> (1, D)
    center_part_ref[...] += jnp.dot(ones_row, t_out, preferred_element_type=jnp.float32)


def _vmem_budgets():
    """(tile budget, scoped-VMEM cap), generation aware (v7x has only 64 MiB VMEM)."""
    try:
        cap = pltpu.get_tpu_info().vmem_capacity_bytes
    except Exception:
        cap = 64 << 20                       # unknown -> be conservative (v7x-safe)
    if cap >= (100 << 20):                   # v5e / v6e: 128 MiB physical VMEM
        return 64 << 20, 96 << 20
    return 24 << 20, 40 << 20                # v7x: 64 MiB physical VMEM


def _choose_tile_rows(batch, d, itemsize, tile_budget):
    """Largest sublane-granule batch tile whose pipelined footprint fits the budget."""
    granule = max(8, 32 // itemsize)         # 8 rows f32 / 16 bf16 / 32 int8-fp8
    # Per-row footprint per step: 2 inputs x 2 pipeline buffers + ~8 f32 temps.
    per_row_bytes = d * (4 * itemsize + 32)
    tb = max(granule, tile_budget // per_row_bytes)
    tb = int(min(tb, batch))
    if tb < batch:
        tb = max(granule, (tb // granule) * granule)
        if batch % tb != 0:
            # Prefer a tile that divides the batch (skips the per-step row mask),
            # but never shrink the tile by more than ~2x for it.
            for cand in range(tb, max(granule, tb // 2) - 1, -granule):
                if batch % cand == 0:
                    tb = cand
                    break
    return tb


def dino_loss(student_out, teacher_out, center,
              teacher_temp=0.04, student_temp=0.1, center_m=0.9,
              tile_rows=None, approx_reciprocal=True):
    """Returns (loss_scalar, new_center[1, D]).

    NOTE: bf16 student/teacher halves HBM traffic (the dominant lever on the
    HBM-bound v5e); in-kernel math stays f32 either way.
    """
    B, D = student_out.shape
    assert teacher_out.shape == (B, D)
    assert center.shape == (1, D)

    itemsize = jnp.dtype(student_out.dtype).itemsize
    tile_budget, vmem_cap = _vmem_budgets()
    tb = tile_rows if tile_rows is not None else _choose_tile_rows(B, D, itemsize, tile_budget)

    n_tiles = -(-B // tb)
    # Leading parallel axis -> one partial-sum pair per TensorCore on v7x.
    n_split = 2 if (n_tiles % 2 == 0 and n_tiles >= 2) else 1
    tiles_per_split = n_tiles // n_split
    masked = (n_tiles * tb != B)
    grid = (n_split, tiles_per_split)

    kernel = functools.partial(
        _dino_loss_kernel,
        inv_teacher_temp=float(1.0 / teacher_temp),
        inv_student_temp=float(1.0 / student_temp),
        batch_size=B, tile_rows=tb, tiles_per_split=tiles_per_split,
        masked=masked, approx_reciprocal=approx_reciprocal)

    # Resident ones vectors used to drive the MXU row/column sums.
    ones_col = jnp.ones((D, 1), jnp.float32)
    ones_row = jnp.ones((1, tb), jnp.float32)

    vmem_est = 2 * 2 * tb * D * itemsize + 8 * tb * D * 4 + 8 * D * 4 + 8 * tb
    vmem_limit = int(min(vmem_cap, max(32 << 20, int(1.5 * vmem_est))))

    cost = pl.CostEstimate(
        flops=16 * B * D,
        transcendentals=2 * B * D + 3 * B,
        bytes_accessed=2 * B * D * itemsize + (2 * D + tb + n_split * (D + 1)) * 4,
    )

    row_map = lambda i, j: (i * tiles_per_split + j, 0)
    loss_parts, center_parts = pl.pallas_call(
        kernel,
        out_shape=(
            jax.ShapeDtypeStruct((n_split, 1, 1), jnp.float32),
            jax.ShapeDtypeStruct((n_split, 1, D), jnp.float32),
        ),
        grid=grid,
        in_specs=[
            pl.BlockSpec((tb, D), row_map),               # student tile
            pl.BlockSpec((tb, D), row_map),               # teacher tile
            pl.BlockSpec((1, D), lambda i, j: (0, 0)),    # center   (resident)
            pl.BlockSpec((D, 1), lambda i, j: (0, 0)),    # ones col (resident)
            pl.BlockSpec((1, tb), lambda i, j: (0, 0)),   # ones row (resident)
        ],
        out_specs=(
            pl.BlockSpec((None, 1, 1), lambda i, j: (i, 0, 0)),   # per-split loss sum
            pl.BlockSpec((None, 1, D), lambda i, j: (i, 0, 0)),   # per-split t_out column sum
        ),
        compiler_params=pltpu.CompilerParams(
            dimension_semantics=("parallel", "arbitrary"),
            vmem_limit_bytes=vmem_limit),
        cost_estimate=cost,
    )(student_out, teacher_out, center, ones_col, ones_row)

    # Tiny epilogue (combine per-core partials + EMA) in plain XLA.
    inv_b = 1.0 / B
    loss = jnp.sum(loss_parts) * inv_b
    batch_center = jnp.sum(center_parts, axis=0) * inv_b            # (1, D)
    new_center = center_m * center.astype(jnp.float32) + (1.0 - center_m) * batch_center
    # TODO(synk): the PyTorch module mutates self.center in place under no_grad;
    # here the EMA'd center is returned functionally and the caller carries it.
    return loss, new_center


def _reference(student_out, teacher_out, center,
               teacher_temp=0.04, student_temp=0.1, center_m=0.9):
    s = student_out.astype(jnp.float32)
    t = teacher_out.astype(jnp.float32)
    t_out = jax.nn.softmax((t - center) / teacher_temp, axis=-1)
    s_out = jax.nn.log_softmax(s / student_temp, axis=-1)
    loss = -(t_out * s_out).sum(axis=-1).mean()
    batch_center = t_out.mean(axis=0, keepdims=True)
    new_center = center * center_m + batch_center * (1.0 - center_m)
    return loss, new_center


if __name__ == "__main__":
    out_dim = 256                      # matches DinoLoss(out_dim=256)
    key = jax.random.PRNGKey(0)
    k1, k2, k3, k4, k5, k6, k7, k8 = jax.random.split(key, 8)
    # register_buffer('center', torch.zeros(1, out_dim)) -> deterministic zeros
    center = jnp.zeros((1, out_dim), dtype=jnp.float32)

    # Tolerance note: the MXU-offloaded f32 reductions may execute as multi-pass
    # bf16 on the MXU depending on TPU generation / default matmul precision;
    # 1e-2 comfortably covers that while still catching real bugs.
    def check(loss, new_center, ref_loss, ref_center, tag):
        assert jnp.allclose(loss, ref_loss, rtol=1e-2, atol=1e-2), (tag, loss, ref_loss)
        assert jnp.allclose(new_center, ref_center, rtol=1e-2, atol=1e-2), tag

    # 1) single tile, exact reciprocal
    s1 = jax.random.normal(k1, (8, out_dim), dtype=jnp.float32)
    t1 = jax.random.normal(k2, (8, out_dim), dtype=jnp.float32)
    loss1, c1 = dino_loss(s1, t1, center, approx_reciprocal=False)
    jax.block_until_ready((loss1, c1))
    r_l, r_c = _reference(s1, t1, center)
    check(loss1, c1, r_l, r_c, "single-tile")

    # 2) multi-tile with a ragged last tile (exercises the row mask), single split
    s2 = jax.random.normal(k3, (20, out_dim), dtype=jnp.float32)
    t2 = jax.random.normal(k4, (20, out_dim), dtype=jnp.float32)
    loss2, c2 = dino_loss(s2, t2, center, tile_rows=8)
    jax.block_until_ready((loss2, c2))
    r_l, r_c = _reference(s2, t2, center)
    check(loss2, c2, r_l, r_c, "ragged")

    # 3) dual-split parallel axis (v7x dual-core path) + ragged last tile
    s3 = jax.random.normal(k5, (28, out_dim), dtype=jnp.float32)
    t3 = jax.random.normal(k6, (28, out_dim), dtype=jnp.float32)
    loss3, c3 = dino_loss(s3, t3, center, tile_rows=8)
    jax.block_until_ready((loss3, c3))
    r_l, r_c = _reference(s3, t3, center)
    check(loss3, c3, r_l, r_c, "dual-split")

    # 4) bf16 inputs (halved HBM traffic; in-kernel math stays f32)
    s4 = jax.random.normal(k7, (16, out_dim), dtype=jnp.bfloat16)
    t4 = jax.random.normal(k8, (16, out_dim), dtype=jnp.bfloat16)
    loss4, c4 = dino_loss(s4, t4, center)
    jax.block_until_ready((loss4, c4))
    assert bool(jnp.isfinite(loss4)) and bool(jnp.all(jnp.isfinite(c4)))
    r_l, r_c = _reference(s4, t4, center)
    check(loss4, c4, r_l, r_c, "bf16")

    print("KERNEL_OK")
</pallas_src>

<mosaic_0001>
module attributes {stable_mosaic.version = 11 : i64} {
  func.func @_dino_loss_kernel(%arg0: i32, %arg1: i32, %arg2: memref<8x256xf32, #tpu.memory_space<vmem>>, %arg3: memref<8x256xf32, #tpu.memory_space<vmem>>, %arg4: memref<1x256xf32, #tpu.memory_space<vmem>>, %arg5: memref<256x1xf32, #tpu.memory_space<vmem>>, %arg6: memref<1x8xf32, #tpu.memory_space<vmem>>, %arg7: memref<1x1x1xf32, #tpu.memory_space<vmem>>, %arg8: memref<1x1x256xf32, #tpu.memory_space<vmem>>) attributes {dimension_semantics = [#tpu.dimension_semantics<parallel>, #tpu.dimension_semantics<arbitrary>], iteration_bounds = array<i64: 1, 1>, scalar_prefetch = 0 : i64, scratch_operands = 0 : i64, tpu.core_type = #tpu.core_type<tc>, window_params = [{transform_indices = @transform_0, window_bounds = array<i64: 8, 256>}, {transform_indices = @transform_1, window_bounds = array<i64: 8, 256>}, {pipeline_mode = #tpu.pipeline_mode<synchronous>, transform_indices = @transform_2, window_bounds = array<i64: 1, 256>}, {pipeline_mode = #tpu.pipeline_mode<synchronous>, transform_indices = @transform_3, window_bounds = array<i64: 256, 1>}, {pipeline_mode = #tpu.pipeline_mode<synchronous>, transform_indices = @transform_4, window_bounds = array<i64: 1, 8>}, {transform_indices = @transform_5, window_bounds = array<i64: 1, 1, 1>}, {transform_indices = @transform_6, window_bounds = array<i64: 1, 1, 256>}]} {
    %c0_i32 = arith.constant 0 : i32
    %0 = arith.cmpi eq, %arg1, %c0_i32 : i32
    %1 = arith.extui %0 : i1 to i32
    %c0_i32_0 = arith.constant 0 : i32
    %2 = arith.cmpi ne, %1, %c0_i32_0 : i32
    scf.if %2 {
      %cst_30 = arith.constant 0.000000e+00 : f32
      %49 = vector.broadcast %cst_30 : f32 to vector<1x1xf32>
      %c0_31 = arith.constant 0 : index
      %c0_32 = arith.constant 0 : index
      %c0_33 = arith.constant 0 : index
      %50 = vector.load %arg7[%c0_31, %c0_32, %c0_33] : memref<1x1x1xf32, #tpu.memory_space<vmem>>, vector<1x1x1xf32>
      %51 = vector.shape_cast %50 : vector<1x1x1xf32> to vector<1x1xf32>
      %52 = vector.shape_cast %49 : vector<1x1xf32> to vector<1x1x1xf32>
      tpu.vector_store %arg7[%c0_31, %c0_32, %c0_33], %52 {strides = array<i32>} : memref<1x1x1xf32, #tpu.memory_space<vmem>>, vector<1x1x1xf32>,
      %cst_34 = arith.constant 0.000000e+00 : f32
      %53 = vector.broadcast %cst_34 : f32 to vector<1x256xf32>
      %c0_35 = arith.constant 0 : index
      %c0_36 = arith.constant 0 : index
      %c0_37 = arith.constant 0 : index
      %54 = vector.load %arg8[%c0_35, %c0_36, %c0_37] : memref<1x1x256xf32, #tpu.memory_space<vmem>>, vector<1x1x256xf32>
      %55 = vector.shape_cast %54 : vector<1x1x256xf32> to vector<1x256xf32>
      %56 = vector.shape_cast %53 : vector<1x256xf32> to vector<1x1x256xf32>
      tpu.vector_store %arg8[%c0_35, %c0_36, %c0_37], %56 {strides = array<i32>} : memref<1x1x256xf32, #tpu.memory_space<vmem>>, vector<1x1x256xf32>,
    } else {
    }
    %c0 = arith.constant 0 : index
    %c0_1 = arith.constant 0 : index
    %3 = vector.load %arg2[%c0, %c0_1] : memref<8x256xf32, #tpu.memory_space<vmem>>, vector<8x256xf32>
    %c0_2 = arith.constant 0 : index
    %c0_3 = arith.constant 0 : index
    %4 = vector.load %arg3[%c0_2, %c0_3] : memref<8x256xf32, #tpu.memory_space<vmem>>, vector<8x256xf32>
    %c0_4 = arith.constant 0 : index
    %c0_5 = arith.constant 0 : index
    %5 = vector.load %arg4[%c0_4, %c0_5] : memref<1x256xf32, #tpu.memory_space<vmem>>, vector<1x256xf32>
    %c0_6 = arith.constant 0 : index
    %c0_7 = arith.constant 0 : index
    %6 = vector.load %arg5[%c0_6, %c0_7] : memref<256x1xf32, #tpu.memory_space<vmem>>, vector<256x1xf32>
    %c0_8 = arith.constant 0 : index
    %c0_9 = arith.constant 0 : index
    %7 = vector.load %arg6[%c0_8, %c0_9] : memref<1x8xf32, #tpu.memory_space<vmem>>, vector<1x8xf32>
    %8 = vector.broadcast %5 : vector<1x256xf32> to vector<8x256xf32>
    %9 = arith.subf %4, %8 : vector<8x256xf32>
    %cst = arith.constant 2.500000e+01 : f32
    %10 = vector.broadcast %cst : f32 to vector<8x256xf32>
    %11 = arith.mulf %9, %10 : vector<8x256xf32>
    %cst_10 = arith.constant dense<0xFF800000> : vector<8xf32>
    %12 = vector.multi_reduction <maximumf>, %11, %cst_10 [1] : vector<8x256xf32> to vector<8xf32>
    %13 = vector.shape_cast %12 : vector<8xf32> to vector<8x1xf32>
    %14 = vector.broadcast %13 : vector<8x1xf32> to vector<8x256xf32>
    %15 = arith.subf %11, %14 : vector<8x256xf32>
    %16 = math.exp %15 : vector<8x256xf32>
    %cst_11 = arith.constant dense<0.000000e+00> : vector<8x1xf32>
    %17 = tpu.matmul %16, %6, %cst_11 {dimension_numbers = #tpu.dot_dimension_numbers<[1], [0], [0], [1], [0, 0, 1, 1], [], []>} : vector<8x256xf32>, vector<256x1xf32>, vector<8x1xf32> -> vector<8x1xf32>
    %18 = tpu.reciprocal %17 : vector<8x1xf32> -> vector<8x1xf32>
    %19 = vector.broadcast %18 : vector<8x1xf32> to vector<8x256xf32>
    %20 = arith.mulf %16, %19 : vector<8x256xf32>
    %cst_12 = arith.constant 1.000000e+01 : f32
    %21 = vector.broadcast %cst_12 : f32 to vector<8x256xf32>
    %22 = arith.mulf %3, %21 : vector<8x256xf32>
    %cst_13 = arith.constant dense<0xFF800000> : vector<8xf32>
    %23 = vector.multi_reduction <maximumf>, %22, %cst_13 [1] : vector<8x256xf32> to vector<8xf32>
    %24 = vector.shape_cast %23 : vector<8xf32> to vector<8x1xf32>
    %25 = vector.broadcast %24 : vector<8x1xf32> to vector<8x256xf32>
    %26 = arith.subf %22, %25 : vector<8x256xf32>
    %27 = math.exp %26 : vector<8x256xf32>
    %cst_14 = arith.constant dense<0.000000e+00> : vector<8x1xf32>
    %28 = tpu.matmul %27, %6, %cst_14 {dimension_numbers = #tpu.dot_dimension_numbers<[1], [0], [0], [1], [0, 0, 1, 1], [], []>} : vector<8x256xf32>, vector<256x1xf32>, vector<8x1xf32> -> vector<8x1xf32>
    %29 = arith.mulf %16, %26 : vector<8x256xf32>
    %cst_15 = arith.constant dense<0.000000e+00> : vector<8x1xf32>
    %30 = tpu.matmul %29, %6, %cst_15 {dimension_numbers = #tpu.dot_dimension_numbers<[1], [0], [0], [1], [0, 0, 1, 1], [], []>} : vector<8x256xf32>, vector<256x1xf32>, vector<8x1xf32> -> vector<8x1xf32>
    %31 = math.log %28 : vector<8x1xf32>
    %32 = arith.mulf %30, %18 : vector<8x1xf32>
    %33 = arith.subf %31, %32 : vector<8x1xf32>
    %c0_16 = arith.constant 0 : index
    %c0_17 = arith.constant 0 : index
    %c0_18 = arith.constant 0 : index
    %34 = vector.load %arg7[%c0_16, %c0_17, %c0_18] : memref<1x1x1xf32, #tpu.memory_space<vmem>>, vector<1x1x1xf32>
    %35 = vector.shape_cast %34 : vector<1x1x1xf32> to vector<1x1xf32>
    %cst_19 = arith.constant dense<0.000000e+00> : vector<1xf32>
    %36 = vector.multi_reduction <add>, %33, %cst_19 [0] : vector<8x1xf32> to vector<1xf32>
    %37 = vector.shape_cast %36 : vector<1xf32> to vector<1x1xf32>
    %38 = arith.addf %35, %37 : vector<1x1xf32>
    %c0_20 = arith.constant 0 : index
    %c0_21 = arith.constant 0 : index
    %c0_22 = arith.constant 0 : index
    %39 = vector.load %arg7[%c0_20, %c0_21, %c0_22] : memref<1x1x1xf32, #tpu.memory_space<vmem>>, vector<1x1x1xf32>
    %40 = vector.shape_cast %39 : vector<1x1x1xf32> to vector<1x1xf32>
    %41 = vector.shape_cast %38 : vector<1x1xf32> to vector<1x1x1xf32>
    tpu.vector_store %arg7[%c0_20, %c0_21, %c0_22], %41 {strides = array<i32>} : memref<1x1x1xf32, #tpu.memory_space<vmem>>, vector<1x1x1xf32>,
    %c0_23 = arith.constant 0 : index
    %c0_24 = arith.constant 0 : index
    %c0_25 = arith.constant 0 : index
    %42 = vector.load %arg8[%c0_23, %c0_24, %c0_25] : memref<1x1x256xf32, #tpu.memory_space<vmem>>, vector<1x1x256xf32>
    %43 = vector.shape_cast %42 : vector<1x1x256xf32> to vector<1x256xf32>
    %cst_26 = arith.constant dense<0.000000e+00> : vector<1x256xf32>
    %44 = tpu.matmul %7, %20, %cst_26 {dimension_numbers = #tpu.dot_dimension_numbers<[1], [0], [0], [1], [0, 0, 1, 1], [], []>} : vector<1x8xf32>, vector<8x256xf32>, vector<1x256xf32> -> vector<1x256xf32>
    %45 = arith.addf %43, %44 : vector<1x256xf32>
    %c0_27 = arith.constant 0 : index
    %c0_28 = arith.constant 0 : index
    %c0_29 = arith.constant 0 : index
    %46 = vector.load %arg8[%c0_27, %c0_28, %c0_29] : memref<1x1x256xf32, #tpu.memory_space<vmem>>, vector<1x1x256xf32>
    %47 = vector.shape_cast %46 : vector<1x1x256xf32> to vector<1x256xf32>
    %48 = vector.shape_cast %45 : vector<1x256xf32> to vector<1x1x256xf32>
    tpu.vector_store %arg8[%c0_27, %c0_28, %c0_29], %48 {strides = array<i32>} : memref<1x1x256xf32, #tpu.memory_space<vmem>>, vector<1x1x256xf32>,
    return
  }
  func.func @transform_0(%arg0: i32, %arg1: i32) -> (i32, i32) {
    %c1_i32 = arith.constant 1 : i32
    %0 = arith.muli %arg0, %c1_i32 : i32
    %1 = arith.addi %0, %arg1 : i32
    %c0_i32 = arith.constant 0 : i32
    %c0_i32_0 = arith.constant 0 : i32
    return %1, %c0_i32 : i32, i32
  }
  func.func @transform_1(%arg0: i32, %arg1: i32) -> (i32, i32) {
    %c1_i32 = arith.constant 1 : i32
    %0 = arith.muli %arg0, %c1_i32 : i32
    %1 = arith.addi %0, %arg1 : i32
    %c0_i32 = arith.constant 0 : i32
    %c0_i32_0 = arith.constant 0 : i32
    return %1, %c0_i32 : i32, i32
  }
  func.func @transform_2(%arg0: i32, %arg1: i32) -> (i32, i32) {
    %c0_i32 = arith.constant 0 : i32
    %c0_i32_0 = arith.constant 0 : i32
    %c0_i32_1 = arith.constant 0 : i32
    return %c0_i32, %c0_i32_0 : i32, i32
  }
  func.func @transform_3(%arg0: i32, %arg1: i32) -> (i32, i32) {
    %c0_i32 = arith.constant 0 : i32
    %c0_i32_0 = arith.constant 0 : i32
    %c0_i32_1 = arith.constant 0 : i32
    return %c0_i32, %c0_i32_0 : i32, i32
  }
  func.func @transform_4(%arg0: i32, %arg1: i32) -> (i32, i32) {
    %c0_i32 = arith.constant 0 : i32
    %c0_i32_0 = arith.constant 0 : i32
    %c0_i32_1 = arith.constant 0 : i32
    return %c0_i32, %c0_i32_0 : i32, i32
  }
  func.func @transform_5(%arg0: i32, %arg1: i32) -> (i32, i32, i32) {
    %c0_i32 = arith.constant 0 : i32
    %c0_i32_0 = arith.constant 0 : i32
    %c0_i32_1 = arith.constant 0 : i32
    return %arg0, %c0_i32, %c0_i32_0 : i32, i32, i32
  }
  func.func @transform_6(%arg0: i32, %arg1: i32) -> (i32, i32, i32) {
    %c0_i32 = arith.constant 0 : i32
    %c0_i32_0 = arith.constant 0 : i32
    %c0_i32_1 = arith.constant 0 : i32
    return %arg0, %c0_i32, %c0_i32_0 : i32, i32, i32
  }
}

</mosaic_0001>

<bundles_post_ra>
// kernel: tpu_custom_call.1
= control target key start
LH: loop header
LB: loop body
LE: loop exit
PB: predicated region body
PF: predicated region fallthrough
CT: control target
= control target key end

     0   :  { %12 = vsyncpa [#allocation3], 0  ;;  %v70_v0 = vlaneseq  ;;  %s1046_s0 = inlined_call_operand.vmem [shape: f32[8,256], index: 0, kind: input, shape index: {}]   ;;  %s1047_s1 = inlined_call_operand.vmem [shape: f32[8,256], index: 1, kind: input, shape index: {}]   ;;  %s1048_s2 = inlined_call_operand.vmem [shape: f32[1,256], index: 2, kind: input, shape index: {}]   ;;  %s1049_s3 = inlined_call_operand.vmem [shape: f32[256,1], index: 3, kind: input, shape index: {}]   ;;  %s1050_s4 = inlined_call_operand.vmem [shape: f32[1,8], index: 4, kind: input, shape index: {}]   ;;  %s1051_s5 = inlined_call_operand.hbm [shape: f32[1,1,1], index: 5, kind: output, shape index: {0}]   ;;  %s1052_s6 = inlined_call_operand.hbm [shape: f32[1,1,256], index: 6, kind: output, shape index: {1}]  }
   0x1   :  { %v736_v1 = vld [vmem:[%s1049_s3 + $0xf8] sm:$0xff]  ;;  %v750_v4 = vld [vmem:[%s1049_s3 + $0xf0] sm:$0xff]  ;;  %v79_v6 = vld [vmem:[%s1048_s2] sm:$0x3] }
   0x2   :  { %v739_v2 = vshrl.u32 %v70_v0, 7  ;;  %525 = vmatprep.subr.mxu0 %v736_v1  ;;  %v745_v3 = vld [vmem:[%s1049_s3 + $0x78] sm:$0xff]  ;;  %v755_v5 = vld [vmem:[%s1049_s3 + $0x70] sm:$0xff]  ;;  %560 = vmatprep.subr.mxu1 %v736_v1  ;;  %v765_v7 = vld [vmem:[%s1049_s3 + $0xe8] sm:$0xff] }
   0x3   :  { %526 = vmatpush3.msra.mxu0 %v745_v3  ;;  %561 = vmatpush3.msra.mxu1 %v745_v3  ;;  %v774_v10 = vld [vmem:[%s1049_s3 + $0x68] sm:$0xff]  ;;  %v77_v11 = vld [vmem:[%s1047_s1] sm:$0xff] }
   0x4   :  { %v116_v8 = vsub.s32 0, %v739_v2  ;;  %v120_v9 = vsub.s32 1, %v739_v2  ;;  %527 = vmatprep.subr.mxu0 %v750_v4  ;;  %562 = vmatprep.subr.mxu1 %v750_v4  ;;  %v78_v12 = vld [vmem:[%s1047_s1 + $0x8] sm:$0xff]  ;;  %v787_v13 = vld [vmem:[%s1049_s3 + $0xe0] sm:$0xff] }
   0x5   :  { %528 = vmatpush3.msra.mxu0 %v755_v5  ;;  %563 = vmatpush3.msra.mxu1 %v755_v5  ;;  %v794_v16 = vld [vmem:[%s1049_s3 + $0x60] sm:$0xff] }
   0x6   :  { %v117_v14 = vrot.slane %v79_v6, %v116_v8  ;;  %v121_v15 = vrot.slane %v79_v6, %v120_v9  ;;  %529 = vmatprep.subr.mxu0 %v765_v7  ;;  %564 = vmatprep.subr.mxu1 %v765_v7 }
   0x7   :  { %13 = vsyncpa [#allocation5], 0  ;;  %v75_v17 = vld [vmem:[%s1046_s0] sm:$0xff]  ;;  %v76_v18 = vld [vmem:[%s1046_s0 + $0x8] sm:$0xff]  ;;  %530 = vmatpush3.msra.mxu0 %v774_v10  ;;  %565 = vmatpush3.msra.mxu1 %v774_v10  ;;  %vm68_vm0 = vcmask 0   ;;  %vm1025_vm1 = vcmp.lt.s32.totalorder %v70_v0, 256 }
   0x8   :  { %v807_v19 = vld [vmem:[%s1049_s3 + $0xd8] sm:$0xff]  ;;  %v124_v20 = vsub.f32 %v77_v11, %v117_v14  ;;  %v125_v21 = vsub.f32 %v78_v12, %v121_v15  ;;  %531 = vmatprep.subr.mxu0 %v787_v13  ;;  %566 = vmatprep.subr.mxu1 %v787_v13  ;;  %v821_v23 = vld [vmem:[%s1049_s3 + $0xd0] sm:$0xff]  ;;  %v828_v26 = vmul.f32 10.0, %v75_v17  ;;  %v830_v27 = vmul.f32 10.0, %v76_v18  ;;  %v843_v29 = vld [vmem:[%s1049_s3 + $0xc8] sm:$0xff]  ;;  %s695_s17 = smov [#allocation2]  }
   0x9   :  { %v814_v22 = vld [vmem:[%s1049_s3 + $0x58] sm:$0xff]  ;;  %532 = vmatpush3.msra.mxu0 %v794_v16  ;;  %567 = vmatpush3.msra.mxu1 %v794_v16  ;;  %v836_v28 = vld [vmem:[%s1049_s3 + $0x50] sm:$0xff]  ;;  %v852_v31 = vld [vmem:[%s1049_s3 + $0x48] sm:$0xff]  ;;  %vm373_vm2 = vcmask 7168   ;;  %vm385_vm3 = vcmask 64512   ;;  %s490_s1 = sshll.u32 %s695_s17, 4  ;;  %s491_s1 = int_to_ptr.vmem [resolvable:$true] %s490_s1 }
   0xa   :  { %v824_v24 = vmul.f32 25.0, %v124_v20  ;;  %v826_v25 = vmul.f32 25.0, %v125_v21  ;;  %533 = vmatprep.subr.mxu0 %v807_v19  ;;  %568 = vmatprep.subr.mxu1 %v807_v19  ;;  %v217_v32 = vmax.f32 %v828_v26, %v830_v27  ;;  %v866_v33 = vld [vmem:[%s1049_s3 + $0xc0] sm:$0xff]  ;;  %v879_v35 = vld [vmem:[%s1049_s3 + $0xb8] sm:$0xff]  ;;  %v893_v37 = vld [vmem:[%s1049_s3 + $0xb0] sm:$0xff]  ;;  %s649_s18 = scalar_lea.vmem %s491_s1, 16  ;;  %p654_p1 = scmp.lt.s32.totalorder %s491_s1, %s491_s1 }
   0xb   :  { %534 = vmatpush3.msra.mxu0 %v814_v22  ;;  %569 = vmatpush3.msra.mxu1 %v814_v22  ;;  %v872_v34 = vld [vmem:[%s1049_s3 + $0x40] sm:$0xff]  ;;  %v886_v36 = vld [vmem:[%s1049_s3 + $0x38] sm:$0xff]  ;;  %v900_v38 = vld [vmem:[%s1049_s3 + $0x30] sm:$0xff]  ;;  %p650_p0 = scmp.ne.s32.totalorder %s491_s1, %s649_s18  ;;  %s653_s19 = scalar_lea.vmem %s491_s1, 32 }
   0xc   :  { %v128_v30 = vmax.f32 %v824_v24, %v826_v25  ;;  %535 = vmatprep.subr.mxu0 %v821_v23  ;;  %570 = vmatprep.subr.mxu1 %v821_v23  ;;  %v905_v39 = vld [vmem:[%s1049_s3 + $0xa8] sm:$0xff]  ;;  %v917_v41 = vld [vmem:[%s1049_s3 + $0xa0] sm:$0xff]  ;;  %v931_v43 = vld [vmem:[%s1049_s3 + $0x98] sm:$0xff]  ;;  %p655_p2 = scmp.lt.s32.totalorder %s653_s19, %s649_s18 }
   0xd   :  { %536 = vmatpush3.msra.mxu0 %v836_v28  ;;  %571 = vmatpush3.msra.mxu1 %v836_v28  ;;  %v910_v40 = vld [vmem:[%s1049_s3 + $0x28] sm:$0xff]  ;;  %v924_v42 = vld [vmem:[%s1049_s3 + $0x20] sm:$0xff]  ;;  %v938_v44 = vld [vmem:[%s1049_s3 + $0x18] sm:$0xff] }
   0xe   :  { %129 = vmax.xlane.f32.xlu0 %v128_v30  ;;  %537 = vmatprep.subr.mxu0 %v843_v29  ;;  %v945_v45 = vld [vmem:[%s1049_s3 + $0x90] sm:$0xff]  ;;  %v959_v47 = vld [vmem:[%s1049_s3 + $0x88] sm:$0xff]  ;;  %v96_v49 = vld [vmem:[%s1049_s3 + $0x80] sm:$0xff]  ;;  %p656_p3 = por %p655_p2, %p654_p1 }
   0xf   :  { %538 = vmatpush3.msra.mxu0 %v852_v31  ;;  %572 = vmatprep.subr.mxu1 %v843_v29  ;;  %v952_v46 = vld [vmem:[%s1049_s3 + $0x10] sm:$0xff]  ;;  %v966_v48 = vld [vmem:[%s1049_s3 + $0x8] sm:$0xff]  ;;  %v80_v50 = vld [vmem:[%s1049_s3] sm:$0xff] }
  0x10   :  { %573 = vmatpush3.msra.mxu1 %v852_v31  ;;  %539 = vmatprep.subr.mxu0 %v866_v33  ;;  %p657_p4 = pnand %p656_p3, %p650_p0 }
  0x11   :  { %574 = vmatprep.subr.mxu1 %v866_v33  ;;  %540 = vmatpush3.msra.mxu0 %v872_v34 }
  0x12   :  { %218 = vmax.xlane.f32.xlu0 %v217_v32  ;;  %575 = vmatpush3.msra.mxu1 %v872_v34 }
  0x13   :  { %541 = vmatprep.subr.mxu0 %v879_v35  ;;  %576 = vmatprep.subr.mxu1 %v879_v35 }
  0x14   :  { %542 = vmatpush3.msra.mxu0 %v886_v36  ;;  %577 = vmatpush3.msra.mxu1 %v886_v36 }
  0x15   :  { %543 = vmatprep.subr.mxu0 %v893_v37  ;;  %578 = vmatprep.subr.mxu1 %v893_v37 }
  0x16   :  { %544 = vmatpush3.msra.mxu0 %v900_v38  ;;  %579 = vmatpush3.msra.mxu1 %v900_v38 }
  0x17   :  { %545 = vmatprep.subr.mxu0 %v905_v39  ;;  %580 = vmatprep.subr.mxu1 %v905_v39 }
  0x18   :  { %546 = vmatpush3.msra.mxu0 %v910_v40  ;;  %581 = vmatpush3.msra.mxu1 %v910_v40 }
  0x19   :  { %547 = vmatprep.subr.mxu0 %v917_v41  ;;  %582 = vmatprep.subr.mxu1 %v917_v41 }
  0x1a   :  { %548 = vmatpush3.msra.mxu0 %v924_v42  ;;  %583 = vmatpush3.msra.mxu1 %v924_v42 }
  0x1b   :  { %549 = vmatprep.subr.mxu0 %v931_v43  ;;  %584 = vmatprep.subr.mxu1 %v931_v43 }
  0x1c   :  { %550 = vmatpush3.msra.mxu0 %v938_v44  ;;  %585 = vmatpush3.msra.mxu1 %v938_v44 }
  0x1d   :  { %551 = vmatprep.subr.mxu0 %v945_v45  ;;  %586 = vmatprep.subr.mxu1 %v945_v45 }
  0x1e   :  { %552 = vmatpush3.msra.mxu0 %v952_v46  ;;  %587 = vmatpush3.msra.mxu1 %v952_v46 }
  0x1f   :  { %553 = vmatprep.subr.mxu0 %v959_v47  ;;  %588 = vmatprep.subr.mxu1 %v959_v47 }
  0x20   :  { %554 = vmatpush3.msra.mxu0 %v966_v48  ;;  %589 = vmatpush3.msra.mxu1 %v966_v48 }
  0x21   :  { %555 = vmatprep.subr.mxu0 %v96_v49  ;;  %590 = vmatprep.subr.mxu1 %v96_v49 }
  0x22   :  { %556 = vmatpush3.msra.mxu0 %v80_v50  ;;  %591 = vmatpush3.msra.mxu1 %v80_v50 }
  0x23   :  { %595 = vmatprep.subr.mxu0 %v736_v1 }
  0x97   :  { %v130_v51 = vpop.xlane.xlu0 %129 }
  0x98   :  { %v131_v52 = vsub.f32 %v824_v24, %v130_v51  ;;  %v132_v53 = vsub.f32 %v826_v25, %v130_v51 }
  0x9a   :  { %v133_v54 = vmul.f32 1.442695, %v131_v52  ;;  %v135_v55 = vmul.f32 1.442695, %v132_v53 }
  0x9b   :  { %v219_v56 = vpop.xlane.xlu0 %218 }
  0x9c   :  { %637 = vpow2.f32 %v133_v54  ;;  %v220_v57 = vsub.f32 %v828_v26, %v219_v56  ;;  %v221_v58 = vsub.f32 %v830_v27, %v219_v56 }
  0x9d   :  { %639 = vpow2.f32 %v135_v55 }
  0x9e   :  { %v222_v59 = vmul.f32 1.442695, %v220_v57  ;;  %v224_v60 = vmul.f32 1.442695, %v221_v58 }
  0xa0   :  { %641 = vpow2.f32 %v222_v59 }
  0xa1   :  { %643 = vpow2.f32 %v224_v60 }
  0xa9   :  { %v986_v61 = vpop.eup %637 }
  0xaa   :  { %v988_v62 = vpop.eup %639 }
  0xab   :  { %v297_v63 = vmul.f32 %v988_v62, %v221_v58  ;;  %201 = vmatprep.mubr.f32.mxu0 %v988_v62 }
  0xac   :  { %202 = vmatmul.mubr.f32.vlgmr.msra.gmra.mxu0 %v986_v61 }
  0xad   :  { %v642_v1 = vpop.eup %641  ;;  %596 = vmatpush3.msra.mxu0 %v745_v3  ;;  %362 = vmatprep.mubr.f32.mxu0 %v297_v63  ;;  %v296_v3 = vmul.f32 %v986_v61, %v220_v57 }
  0xae   :  { %v644_v6 = vpop.eup %643  ;;  %597 = vmatprep.subr.mxu0 %v750_v4  ;;  %v693_v4 = vmov 0  }
  0xaf   :  { %598 = vmatpush3.msra.mxu0 %v755_v5  ;;  %290 = vmatprep.mubr.f32.mxu1 %v644_v6  ;;  %v694_v5 = vmov 0.0  }
  0xb0   :  { %599 = vmatprep.subr.mxu0 %v765_v7  ;;  %291 = vmatmul.mubr.f32.vlgmr.msra.gmra.mxu1 %v642_v1  ;;  %69 = vst.msk [vmem:[#allocation2] sm:$0x1] %vm68_vm0, %v694_v5 }
  0xb1   :  { %600 = vmatpush3.msra.mxu0 %v774_v10  ;;  %635 = vset.pattern.permute.xlu1 %v693_v4  ;;  %74 = vst.msk [vmem:[#allocation4] sm:$0x3] %vm1025_vm1, %v694_v5 }
  0xb2   :  { %601 = vmatprep.subr.mxu0 %v787_v13  ;;  %636 = vset.pattern.permute.xlu0 %v693_v4 }
  0xb3   :  { %602 = vmatpush3.msra.mxu0 %v794_v16  ;;  %453 = vmatprep.mubr.f32.mxu1 %v694_v5 }
  0xb4   :  { %603 = vmatprep.subr.mxu0 %v807_v19 }
  0xb5   :  { %604 = vmatpush3.msra.mxu0 %v814_v22 }
  0xb6   :  { %605 = vmatprep.subr.mxu0 %v821_v23 }
  0xb7   :  { %606 = vmatpush3.msra.mxu0 %v836_v28  ;;  %v372_v27 = vld [vmem:[#allocation2] sm:$0x1] }
  0xb8   :  { %607 = vmatprep.subr.mxu0 %v843_v29 }
  0xb9   :  { %608 = vmatpush3.msra.mxu0 %v852_v31 }
  0xba   :  { %609 = vmatprep.subr.mxu0 %v866_v33  ;;  %v112_v33 = vld [vmem:[%s1050_s4] sm:$0x1] }
  0xbb   :  { %610 = vmatpush3.msra.mxu0 %v872_v34 }
  0xbc   :  { %611 = vmatprep.subr.mxu0 %v879_v35 }
  0xbd   :  { %612 = vmatpush3.msra.mxu0 %v886_v36 }
  0xbe   :  { %613 = vmatprep.subr.mxu0 %v893_v37 }
  0xbf   :  { %614 = vmatpush3.msra.mxu0 %v900_v38 }
  0xc0   :  { %615 = vmatprep.subr.mxu0 %v905_v39 }
  0xc1   :  { %616 = vmatpush3.msra.mxu0 %v910_v40 }
  0xc2   :  { %617 = vmatprep.subr.mxu0 %v917_v41 }
  0xc3   :  { %618 = vmatpush3.msra.mxu0 %v924_v42 }
  0xc4   :  { %619 = vmatprep.subr.mxu0 %v931_v43 }
  0xc5   :  { %620 = vmatpush3.msra.mxu0 %v938_v44 }
  0xc6   :  { %621 = vmatprep.subr.mxu0 %v945_v45 }
  0xc7   :  { %622 = vmatpush3.msra.mxu0 %v952_v46 }
  0xc8   :  { %623 = vmatprep.subr.mxu0 %v959_v47 }
  0xc9   :  { %624 = vmatpush3.msra.mxu0 %v966_v48 }
  0xca   :  { %625 = vmatprep.subr.mxu0 %v96_v49 }
  0xcb   :  { %626 = vmatpush3.msra.mxu0 %v80_v50 }
  0xcc   :  { %363 = vmatmul.mubr.f32.vlgmr.msra.gmra.mxu0 %v296_v3 }
 0x16c   :  { %v557_v7 = vpop.f32.mrf.mxu0 }
 0x16e   :  { %v558_v8 = vpop.f32.mrf.mxu0 }
 0x16f   :  { %v559_v9 = vadd.f32 %v558_v8, %v557_v7 }
 0x170   :  { %v592_v10 = vpop.f32.mrf.mxu1 }
 0x171   :  { %645 = vrcp.f32 %v559_v9 }
 0x172   :  { %v593_v11 = vpop.f32.mrf.mxu1 }
 0x173   :  { %v594_v12 = vadd.f32 %v593_v11, %v592_v10 }
 0x175   :  { %647 = vlog2.f32 %v594_v12 }
 0x17e   :  { %v646_v13 = vpop.eup %645 }
 0x17f   :  { %210 = vperm.xlu1 %635, %v646_v13  }
 0x182   :  { %v648_v15 = vpop.eup %647 }
 0x183   :  { %v369_v18 = vmul.f32 0.6931472, %v648_v15 }
 0x18c   :  { %v627_v16 = vpop.f32.mrf.mxu0 }
 0x18e   :  { %v628_v17 = vpop.f32.mrf.mxu0 }
 0x18f   :  { %v629_v19 = vadd.f32 %v628_v17, %v627_v16 }
 0x191   :  { %v370_v20 = vmul.f32 %v646_v13, %v629_v19 }
 0x193   :  { %v371_v21 = vsub.f32 %v369_v18, %v370_v20 }
 0x195   :  { %v374_v22 = vsel %vm373_vm2, %v371_v21, 0.0 }
 0x196   :  { %v375_v23 = vrot.slane %v374_v22, 4 }
 0x198   :  { %v376_v24 = vadd.f32 %v375_v23, %v374_v22 }
 0x19a   :  { %v377_v0 = vrot.slane %v376_v24, 2 }
 0x19c   :  { %v378_v25 = vadd.f32 %v377_v0, %v376_v24 }
 0x19e   :  { %v379_v26 = vrot.slane %v378_v25, 1 }
 0x1a0   :  { %v380_v28 = vadd.f32 %v379_v26, %v378_v25 }
 0x1a2   :  { %v381_v29 = vadd.f32 %v380_v28, %v372_v27 }
 0x1a4   :  { %383 = vst.msk [vmem:[#allocation2] sm:$0x1] %vm68_vm0, %v381_v29 }
 0x1fa   :  { %v211_v30 = vpop.permute.xlu1 %210 }
 0x1fb   :  { %v213_v31 = vmul.f32 %v986_v61, %v211_v30  ;;  %v214_v32 = vmul.f32 %v988_v62, %v211_v30 }
 0x1fd   :  { %419 = vmatprep.subr.mxu1 %v214_v32 }
 0x1fe   :  { %420 = vmatpush1.msra.mxu1 %v213_v31 }
 0x1ff   :  { %524 = vmatmul.mubr.msk.f32.vlgmr.msra.gmra.mxu1 %vm385_vm3, %v112_v33 }
 0x200   :  { %660 = shalt.err (!%p657_p4)
}
 0x201   :  { %493 = dma.vmem_to_hbm [thread:$0]  %s491_s1, 16, %s1051_s5, [#allocation3]   ;;  %v696_v34 = vmov 1966171168   ;;  %v384_v42 = vld [vmem:[#allocation4] sm:$0x3] }
 0x202   :  { %v464_v35 = vunpack.c.l.s4 %v696_v34  ;;  %s697_s4 = smov [#allocation4]  }
 0x203   :  { %s500_s22 = sshll.u32 %s697_s4, 4  ;;  %s501_s22 = int_to_ptr.vmem [resolvable:$true] %s500_s22 }
 0x204   :  { %v465_v36 = vunpack.c.0.s8 %v464_v35  ;;  %s669_s23 = scalar_lea.vmem %s501_s22, 32  ;;  %p674_p6 = scmp.lt.s32.totalorder %s501_s22, %s501_s22 }
 0x205   :  { %p670_p5 = scmp.ne.s32.totalorder %s501_s22, %s669_s23  ;;  %p675_p7 = scmp.lt.s32.totalorder %s669_s23, %s669_s23 }
 0x206   :  { %v468_v38 = vsub.s32 %v465_v36, %v739_v2 }
 0x207   :  { %p676_p8 = por %p675_p7, %p674_p6 }
 0x209   :  { %p677_p9 = pnand %p676_p8, %p670_p5 }
 0x2bf   :  { %v455_v37 = vpop.f32.mrf.mxu1 }
 0x2c1   :  { %v457_v39 = vpop.f32.mrf.mxu1 }
 0x2c2   :  { %v462_v40 = vcombine.low %v455_v37, %v457_v39 }
 0x2c4   :  { %v469_v41 = vrot.slane %v462_v40, %v468_v38 }
 0x2c6   :  { %v476_v43 = vrot.slane %v469_v41, %v468_v38 }
 0x2c8   :  { %v478_v44 = vadd.f32 %v476_v43, %v384_v42 }
 0x2ca   :  { %483 = vst.msk [vmem:[#allocation4] sm:$0x3] %vm1025_vm1, %v478_v44 }
 0x2cb   :  { %680 = shalt.err (!%p677_p9)
}
 0x2cc   :  { %503 = dma.vmem_to_hbm [thread:$0]  %s501_s22, 32, %s1052_s6, [#allocation5]  }
 0x2cd   :  { %689 = dma.done.wait [#allocation3], 16  }
 0x2ce   :  { %690 = vsyncadd [#allocation3], 4294967280 }
 0x2cf   :  { %691 = dma.done.wait [#allocation5], 32  }
 0x2d0   :  { %692 = vsyncadd [#allocation5], 4294967264 }
 0x2d1   :  { %510 = vsyncpa [#allocation3], 1 }
 0x2d2   :  { %511 = vsyncpa [#allocation5], 1 }

</bundles_post_ra>
